<compile_context>
chip_gen: v7x
topology: tpu7x:2x2x1
jax: 0.10.0
libtpu: 0.0.40
codegen_flags: <defaults>
</compile_context>

<pallas_src>
import functools

import jax
import jax.numpy as jnp
from jax.experimental import pallas as pl
from jax.experimental.pallas import tpu as pltpu


LANES = 128
SUBLANES = 8
_ALIGN = SUBLANES * LANES            # 1024 elements == one (8,128) f32 tile
_TARGET_BLOCK_BYTES = 8 * 1024 * 1024   # combined (x + target) bytes per step
_VMEM_LIMIT_BYTES = 32 * 1024 * 1024    # > v5e's 16 MiB scoped default,
                                        # << v7x's 64 MiB physical VMEM
_CHUNK_ROWS = 512                    # inner-loop chunk (keeps temps ~256 KiB)


@functools.lru_cache(maxsize=None)
def _num_tensorcores():
    """Best-effort TensorCores-per-chip query (2 on v7x, 1 on v5e/v6e)."""
    try:
        info = pltpu.get_tpu_info()
        for attr in ("num_cores", "core_count", "num_tensorcores",
                     "tensorcore_count", "cores_per_chip"):
            val = getattr(info, attr, None)
            if isinstance(val, int) and val > 0:
                return val
    except Exception:
        pass
    try:
        dev = jax.devices()[0]
        for attr in ("num_cores", "core_count"):
            val = getattr(dev, attr, None)
            if isinstance(val, int) and val > 0:
                return val
    except Exception:
        pass
    return 1


def _dice_partial_kernel(x_ref, t_ref, xt_ref, sq_ref, *,
                         apply_sigmoid, tile_rows, blocks_per_core,
                         num_full_blocks, ragged_rows, has_dup):
    c = pl.program_id(0)   # core-parallel axis
    i = pl.program_id(1)   # reduction axis ("arbitrary")

    @pl.when(i == 0)
    def _init():
        xt_ref[...] = jnp.zeros_like(xt_ref)
        sq_ref[...] = jnp.zeros_like(sq_ref)

    def _chunk_sums(row0, nrows):
        # Static-shape (nrows, 128) chunk starting at (tile-aligned) row0.
        x = x_ref[pl.ds(row0, nrows), :].astype(jnp.float32)
        if apply_sigmoid:
            # sigmoid(x) = 0.5*tanh(0.5*x) + 0.5 : the transcendental runs in
            # the EUP slot; only 2 cheap VPU ops remain (no f32 divide).
            x = 0.5 * jnp.tanh(0.5 * x) + 0.5
        t = t_ref[pl.ds(row0, nrows), :].astype(jnp.float32)
        xt = x * t
        sq = x * x + t * t
        # (nrows,128) -> (nrows//8, 8, 128): free regrouping of native (8,128)
        # tiles; the axis-0 sum is pure per-vreg VPU adds.  The cross-lane
        # reduction happens once on the tiny (8,128) partials in the wrapper.
        xt_p = jnp.sum(xt.reshape(nrows // SUBLANES, SUBLANES, LANES), axis=0)
        sq_p = jnp.sum(sq.reshape(nrows // SUBLANES, SUBLANES, LANES), axis=0)
        return xt_p, sq_p

    def _accumulate(limit_rows):
        # limit_rows is a static Python int (multiple of 8): tile_rows for a
        # full block, ragged_rows for the last (smaller) block.  No runtime
        # masking is ever needed.
        chunk = min(_CHUNK_ROWS, limit_rows)
        n_chunks = limit_rows // chunk
        rem = limit_rows - n_chunks * chunk      # static, multiple of 8

        zero = jnp.zeros((SUBLANES, LANES), jnp.float32)
        if n_chunks > 1:
            def body(j, carry):
                xt_a, sq_a = carry
                row0 = pl.multiple_of(j * chunk, chunk)
                xt_p, sq_p = _chunk_sums(row0, chunk)
                return xt_a + xt_p, sq_a + sq_p
            xt_a, sq_a = jax.lax.fori_loop(0, n_chunks, body, (zero, zero))
        else:
            xt_a, sq_a = _chunk_sums(0, chunk)
        if rem:
            xt_p, sq_p = _chunk_sums(n_chunks * chunk, rem)
            xt_a = xt_a + xt_p
            sq_a = sq_a + sq_p
        xt_ref[0] += xt_a
        sq_ref[0] += sq_a

    has_ragged = ragged_rows > 0   # static

    if not has_ragged and not has_dup:
        # Hot path: every block is full -- no branches, no masks.
        _accumulate(tile_rows)
    else:
        lb = c * blocks_per_core + i          # unclamped linear block id

        @pl.when(lb < num_full_blocks)
        def _full_block():
            _accumulate(tile_rows)

        if has_ragged:
            @pl.when(lb == num_full_blocks)
            def _ragged_block():
                _accumulate(ragged_rows)
        # Blocks past the last real one (clamped duplicates on the parallel
        # axis when nblocks is odd) contribute nothing.


def dice_loss(x, target, epsilon=1e-6, normalization="sigmoid",
              block_rows=None):
    assert x.shape == target.shape
    assert normalization in ("sigmoid", "softmax")
    apply_sigmoid = normalization == "sigmoid"

    if not apply_sigmoid:
        # TODO(synk): fuse the channel (axis=1) softmax into the kernel with a
        # (1, C, hw_tile) BlockSpec; this wrapper pass costs an extra f32
        # read+write of x on the softmax path.
        x = jax.nn.softmax(x.astype(jnp.float32), axis=1)

    # Keep targets narrow in HBM: bool -> int8 (1 B/elem); the f32 upcast
    # happens on the VPU inside the kernel.  Other dtypes stream natively.
    if target.dtype == jnp.bool_:
        target = target.astype(jnp.int8)

    n = x.size

    if n == 0 or n % _ALIGN != 0:
        # TODO(synk): sizes that are not a multiple of 8*128 cannot be viewed
        # as a lane-aligned (rows, 128) array without a materializing HBM
        # copy, so reduce them with one fused XLA pass (same 1x HBM traffic).
        p = x.astype(jnp.float32)
        if apply_sigmoid:
            p = jax.nn.sigmoid(p)
        t = target.astype(jnp.float32)
        pf, tf = p.reshape(-1), t.reshape(-1)
        intersect = jnp.sum(pf * tf)
        denom_sum = jnp.sum(pf * pf) + jnp.sum(tf * tf)
        denom = jnp.maximum(denom_sum, jnp.float32(epsilon))
        return 1.0 - 2.0 * intersect / denom

    rows = n // LANES                       # multiple of 8
    x2d = jnp.reshape(x, (rows, LANES))     # free (bitcast) reshape
    t2d = jnp.reshape(target, (rows, LANES))

    # --- tile selection: ~8 MiB of combined (x, t) bytes per grid step ------
    bytes_per_row = LANES * (x2d.dtype.itemsize + t2d.dtype.itemsize)
    if block_rows is None:
        tile_rows = (_TARGET_BLOCK_BYTES // bytes_per_row // 1024) * 1024
        tile_rows = max(tile_rows, 1024)
    else:
        tile_rows = max(32, (block_rows // 32) * 32)
    tile_rows = min(tile_rows, rows)

    num_full = rows // tile_rows
    ragged_rows = rows - num_full * tile_rows          # multiple of 8
    nblocks = num_full + (1 if ragged_rows else 0)

    # Megacore split only when the chip actually has >1 TensorCore.
    ncores = 2 if (_num_tensorcores() >= 2 and nblocks >= 2) else 1
    bpc = -(-nblocks // ncores)                        # blocks per core
    has_dup = ncores * bpc > nblocks

    kernel = functools.partial(
        _dice_partial_kernel,
        apply_sigmoid=apply_sigmoid,
        tile_rows=tile_rows,
        blocks_per_core=bpc,
        num_full_blocks=num_full,
        ragged_rows=ragged_rows,
        has_dup=has_dup,
    )

    def in_map(c, i):
        # Clamp so duplicate trailing blocks stay in-bounds; the kernel simply
        # skips accumulation for them.
        return (jnp.minimum(c * bpc + i, nblocks - 1), 0)

    def out_map(c, i):
        return (c, 0, 0)

    cost = pl.CostEstimate(
        flops=int(8 * n),
        transcendentals=int(n) if apply_sigmoid else 0,
        bytes_accessed=int(n * x2d.dtype.itemsize
                           + n * t2d.dtype.itemsize
                           + 2 * ncores * SUBLANES * LANES * 4),
    )

    part_xt, part_sq = pl.pallas_call(
        kernel,
        out_shape=(
            jax.ShapeDtypeStruct((ncores, SUBLANES, LANES), jnp.float32),
            jax.ShapeDtypeStruct((ncores, SUBLANES, LANES), jnp.float32),
        ),
        grid_spec=pltpu.PrefetchScalarGridSpec(
            num_scalar_prefetch=0,
            grid=(ncores, bpc),
            in_specs=[
                pl.BlockSpec((tile_rows, LANES), in_map),
                pl.BlockSpec((tile_rows, LANES), in_map),
            ],
            out_specs=[
                pl.BlockSpec((1, SUBLANES, LANES), out_map),
                pl.BlockSpec((1, SUBLANES, LANES), out_map),
            ],
        ),
        compiler_params=pltpu.CompilerParams(
            dimension_semantics=("parallel", "arbitrary"),
            vmem_limit_bytes=_VMEM_LIMIT_BYTES,
        ),
        cost_estimate=cost,
    )(x2d, t2d)

    intersect = jnp.sum(part_xt)
    denom_sum = jnp.sum(part_sq)
    denom = jnp.maximum(denom_sum, jnp.float32(epsilon))
    return 1.0 - 2.0 * intersect / denom


def _reference_dice_loss(x, target, epsilon=1e-6, normalization="sigmoid"):
    xi = x.astype(jnp.float32)
    if normalization == "sigmoid":
        xi = jax.nn.sigmoid(xi)
    else:
        xi = jax.nn.softmax(xi, axis=1)
    xi = xi.reshape(-1)
    ti = target.astype(jnp.float32).reshape(-1)
    intersect = jnp.sum(xi * ti)
    denom = jnp.maximum(jnp.sum(xi * xi) + jnp.sum(ti * ti), epsilon)
    return 1.0 - 2.0 * intersect / denom


def _check(loss, ref):
    loss = jax.block_until_ready(loss)
    assert jnp.allclose(loss, ref, atol=1e-4, rtol=1e-4), (float(loss),
                                                           float(ref))


if __name__ == "__main__":
    key = jax.random.PRNGKey(0)
    ks = jax.random.split(key, 8)

    # Test 1: primary small NCHW case, sigmoid path (single aligned block).
    x1 = jax.random.normal(ks[0], (2, 4, 16, 16), dtype=jnp.float32)
    t1 = (jax.random.uniform(ks[1], (2, 4, 16, 16)) > 0.5).astype(jnp.float32)
    _check(dice_loss(x1, t1), _reference_dice_loss(x1, t1))

    # Test 2a: single large block exercising the chunked inner loop
    # (rows = 2304 -> 4 full 512-row chunks + a 256-row remainder chunk).
    x2 = jax.random.normal(ks[2], (2, 3, 192, 256), dtype=jnp.float32)
    t2 = (jax.random.uniform(ks[3], (2, 3, 192, 256)) > 0.5).astype(jnp.float32)
    _check(dice_loss(x2, t2), _reference_dice_loss(x2, t2))

    # Test 2b: forced small blocks -> multi-block grid with a ragged final
    # block (and the 2-core split + duplicate-block skip on multi-TC chips).
    _check(dice_loss(x2, t2, block_rows=1024), _reference_dice_loss(x2, t2))

    # Test 3: non-(8*128)-aligned size -> fused pure-JAX fallback path.
    x3 = jax.random.normal(ks[4], (2, 3, 17, 19), dtype=jnp.float32)
    t3 = (jax.random.uniform(ks[5], (2, 3, 17, 19)) > 0.5).astype(jnp.float32)
    _check(dice_loss(x3, t3), _reference_dice_loss(x3, t3))

    # Test 4: softmax normalization path.
    _check(dice_loss(x1, t1, normalization="softmax"),
           _reference_dice_loss(x1, t1, normalization="softmax"))

    # Test 5: bf16 logits + boolean targets (narrow native dtypes in HBM,
    # upcast on the VPU inside the kernel).
    x5 = jax.random.normal(ks[6], (2, 4, 16, 16), dtype=jnp.bfloat16)
    t5 = jax.random.uniform(ks[7], (2, 4, 16, 16)) > 0.5
    _check(dice_loss(x5, t5), _reference_dice_loss(x5, t5))

    print("KERNEL_OK")
</pallas_src>

<mosaic_0001>
module attributes {stable_mosaic.version = 11 : i64} {
  func.func @_dice_partial_kernel(%arg0: i32, %arg1: i32, %arg2: memref<16x128xf32, #tpu.memory_space<vmem>>, %arg3: memref<16x128xf32, #tpu.memory_space<vmem>>, %arg4: memref<1x8x128xf32, #tpu.memory_space<vmem>>, %arg5: memref<1x8x128xf32, #tpu.memory_space<vmem>>) attributes {dimension_semantics = [#tpu.dimension_semantics<parallel>, #tpu.dimension_semantics<arbitrary>], iteration_bounds = array<i64: 1, 1>, scalar_prefetch = 0 : i64, scratch_operands = 0 : i64, tpu.core_type = #tpu.core_type<tc>, window_params = [{transform_indices = @transform_0, window_bounds = array<i64: 16, 128>}, {transform_indices = @transform_1, window_bounds = array<i64: 16, 128>}, {transform_indices = @transform_2, window_bounds = array<i64: 1, 8, 128>}, {transform_indices = @transform_3, window_bounds = array<i64: 1, 8, 128>}]} {
    %c0_i32 = arith.constant 0 : i32
    %0 = arith.cmpi eq, %arg1, %c0_i32 : i32
    %1 = arith.extui %0 : i1 to i32
    %c0_i32_0 = arith.constant 0 : i32
    %2 = arith.cmpi ne, %1, %c0_i32_0 : i32
    scf.if %2 {
      %cst_20 = arith.constant 0.000000e+00 : f32
      %32 = vector.broadcast %cst_20 : f32 to vector<1x8x128xf32>
      %c0_21 = arith.constant 0 : index
      %c0_22 = arith.constant 0 : index
      %c0_23 = arith.constant 0 : index
      %33 = vector.load %arg4[%c0_21, %c0_22, %c0_23] : memref<1x8x128xf32, #tpu.memory_space<vmem>>, vector<1x8x128xf32>
      tpu.vector_store %arg4[%c0_21, %c0_22, %c0_23], %32 {strides = array<i32>} : memref<1x8x128xf32, #tpu.memory_space<vmem>>, vector<1x8x128xf32>,
      %cst_24 = arith.constant 0.000000e+00 : f32
      %34 = vector.broadcast %cst_24 : f32 to vector<1x8x128xf32>
      %c0_25 = arith.constant 0 : index
      %c0_26 = arith.constant 0 : index
      %c0_27 = arith.constant 0 : index
      %35 = vector.load %arg5[%c0_25, %c0_26, %c0_27] : memref<1x8x128xf32, #tpu.memory_space<vmem>>, vector<1x8x128xf32>
      tpu.vector_store %arg5[%c0_25, %c0_26, %c0_27], %34 {strides = array<i32>} : memref<1x8x128xf32, #tpu.memory_space<vmem>>, vector<1x8x128xf32>,
    } else {
    }
    %c0 = arith.constant 0 : index
    %c0_1 = arith.constant 0 : index
    %3 = vector.load %arg2[%c0, %c0_1] : memref<16x128xf32, #tpu.memory_space<vmem>>, vector<16x128xf32>
    %cst = arith.constant 5.000000e-01 : f32
    %4 = vector.broadcast %cst : f32 to vector<16x128xf32>
    %5 = arith.mulf %4, %3 : vector<16x128xf32>
    %6 = math.tanh %5 : vector<16x128xf32>
    %cst_2 = arith.constant 5.000000e-01 : f32
    %7 = vector.broadcast %cst_2 : f32 to vector<16x128xf32>
    %8 = arith.mulf %7, %6 : vector<16x128xf32>
    %cst_3 = arith.constant 5.000000e-01 : f32
    %9 = vector.broadcast %cst_3 : f32 to vector<16x128xf32>
    %10 = arith.addf %8, %9 : vector<16x128xf32>
    %c0_4 = arith.constant 0 : index
    %c0_5 = arith.constant 0 : index
    %11 = vector.load %arg3[%c0_4, %c0_5] : memref<16x128xf32, #tpu.memory_space<vmem>>, vector<16x128xf32>
    %12 = arith.mulf %10, %11 : vector<16x128xf32>
    %13 = arith.mulf %10, %10 : vector<16x128xf32>
    %14 = arith.mulf %11, %11 : vector<16x128xf32>
    %15 = arith.addf %13, %14 : vector<16x128xf32>
    %16 = vector.shape_cast %12 : vector<16x128xf32> to vector<2x8x128xf32>
    %cst_6 = arith.constant dense<0.000000e+00> : vector<8x128xf32>
    %17 = vector.multi_reduction <add>, %16, %cst_6 [0] : vector<2x8x128xf32> to vector<8x128xf32>
    %18 = vector.shape_cast %15 : vector<16x128xf32> to vector<2x8x128xf32>
    %cst_7 = arith.constant dense<0.000000e+00> : vector<8x128xf32>
    %19 = vector.multi_reduction <add>, %18, %cst_7 [0] : vector<2x8x128xf32> to vector<8x128xf32>
    %c0_8 = arith.constant 0 : index
    %c0_9 = arith.constant 0 : index
    %c0_10 = arith.constant 0 : index
    %20 = vector.load %arg4[%c0_8, %c0_9, %c0_10] : memref<1x8x128xf32, #tpu.memory_space<vmem>>, vector<1x8x128xf32>
    %21 = vector.shape_cast %20 : vector<1x8x128xf32> to vector<8x128xf32>
    %22 = arith.addf %21, %17 : vector<8x128xf32>
    %c0_11 = arith.constant 0 : index
    %c0_12 = arith.constant 0 : index
    %c0_13 = arith.constant 0 : index
    %23 = vector.load %arg4[%c0_11, %c0_12, %c0_13] : memref<1x8x128xf32, #tpu.memory_space<vmem>>, vector<1x8x128xf32>
    %24 = vector.shape_cast %23 : vector<1x8x128xf32> to vector<8x128xf32>
    %25 = vector.shape_cast %22 : vector<8x128xf32> to vector<1x8x128xf32>
    tpu.vector_store %arg4[%c0_11, %c0_12, %c0_13], %25 {strides = array<i32>} : memref<1x8x128xf32, #tpu.memory_space<vmem>>, vector<1x8x128xf32>,
    %c0_14 = arith.constant 0 : index
    %c0_15 = arith.constant 0 : index
    %c0_16 = arith.constant 0 : index
    %26 = vector.load %arg5[%c0_14, %c0_15, %c0_16] : memref<1x8x128xf32, #tpu.memory_space<vmem>>, vector<1x8x128xf32>
    %27 = vector.shape_cast %26 : vector<1x8x128xf32> to vector<8x128xf32>
    %28 = arith.addf %27, %19 : vector<8x128xf32>
    %c0_17 = arith.constant 0 : index
    %c0_18 = arith.constant 0 : index
    %c0_19 = arith.constant 0 : index
    %29 = vector.load %arg5[%c0_17, %c0_18, %c0_19] : memref<1x8x128xf32, #tpu.memory_space<vmem>>, vector<1x8x128xf32>
    %30 = vector.shape_cast %29 : vector<1x8x128xf32> to vector<8x128xf32>
    %31 = vector.shape_cast %28 : vector<8x128xf32> to vector<1x8x128xf32>
    tpu.vector_store %arg5[%c0_17, %c0_18, %c0_19], %31 {strides = array<i32>} : memref<1x8x128xf32, #tpu.memory_space<vmem>>, vector<1x8x128xf32>,
    return
  }
  func.func @transform_0(%arg0: i32, %arg1: i32) -> (i32, i32) {
    %c1_i32 = arith.constant 1 : i32
    %0 = arith.muli %arg0, %c1_i32 : i32
    %1 = arith.addi %0, %arg1 : i32
    %c0_i32 = arith.constant 0 : i32
    %2 = arith.minsi %1, %c0_i32 : i32
    %c0_i32_0 = arith.constant 0 : i32
    %c0_i32_1 = arith.constant 0 : i32
    return %2, %c0_i32_0 : i32, i32
  }
  func.func @transform_1(%arg0: i32, %arg1: i32) -> (i32, i32) {
    %c1_i32 = arith.constant 1 : i32
    %0 = arith.muli %arg0, %c1_i32 : i32
    %1 = arith.addi %0, %arg1 : i32
    %c0_i32 = arith.constant 0 : i32
    %2 = arith.minsi %1, %c0_i32 : i32
    %c0_i32_0 = arith.constant 0 : i32
    %c0_i32_1 = arith.constant 0 : i32
    return %2, %c0_i32_0 : i32, i32
  }
  func.func @transform_2(%arg0: i32, %arg1: i32) -> (i32, i32, i32) {
    %c0_i32 = arith.constant 0 : i32
    %c0_i32_0 = arith.constant 0 : i32
    %c0_i32_1 = arith.constant 0 : i32
    return %arg0, %c0_i32, %c0_i32_0 : i32, i32, i32
  }
  func.func @transform_3(%arg0: i32, %arg1: i32) -> (i32, i32, i32) {
    %c0_i32 = arith.constant 0 : i32
    %c0_i32_0 = arith.constant 0 : i32
    %c0_i32_1 = arith.constant 0 : i32
    return %arg0, %c0_i32, %c0_i32_0 : i32, i32, i32
  }
}

</mosaic_0001>

<bundles_post_ra>
// kernel: tpu_custom_call.1
= control target key start
LH: loop header
LB: loop body
LE: loop exit
PB: predicated region body
PF: predicated region fallthrough
CT: control target
= control target key end

     0   :  { %9 = vsyncpa [#allocation3], 0  ;;  %s312_s0 = inlined_call_operand.hbm [shape: f32[16,128], index: 0, kind: input, shape index: {}]   ;;  %s313_s1 = inlined_call_operand.hbm [shape: f32[16,128], index: 1, kind: input, shape index: {}]   ;;  %s314_s2 = inlined_call_operand.hbm [shape: f32[1,8,128], index: 2, kind: output, shape index: {0}]   ;;  %s315_s3 = inlined_call_operand.hbm [shape: f32[1,8,128], index: 3, kind: output, shape index: {1}]  }
   0x1   :  { %10 = vsyncpa [#allocation6], 0 }
   0x2   :  { %11 = vsyncpa [#allocation4], 0 }
   0x3   :  { %12 = vsyncpa [#allocation9], 0  ;;  %s238_s12 = smov [#allocation2]   ;;  %s142_s16 = scalar_lea.hbm %s312_s0, 256 }
   0x4   :  { %s24_s13 = sshll.u32 %s238_s12, 4  ;;  %p143_p0 = scmp.ne.s32.totalorder %s312_s0, %s142_s16  ;;  %s25_s13 = int_to_ptr.vmem [resolvable:$true] %s24_s13 }
   0x5   :  { %p146_p1 = scmp.lt.u32.totalorder %s142_s16, %s312_s0 }
   0x7   :  { %p148_p2 = pnand %p146_p1, %p143_p0 }
   0x9   :  { %151 = shalt.err (!%p148_p2)
}
   0xa   :  { %s152_s21 = scalar_lea.vmem %s25_s13, 256  ;;  %p157_p4 = scmp.lt.s32.totalorder %s25_s13, %s25_s13 }
   0xb   :  { %p153_p3 = scmp.ne.s32.totalorder %s25_s13, %s152_s21  ;;  %p158_p5 = scmp.lt.s32.totalorder %s152_s21, %s152_s21 }
   0xd   :  { %p159_p6 = por %p158_p5, %p157_p4 }
   0xf   :  { %p160_p7 = pnand %p159_p6, %p153_p3 }
  0x11   :  { %163 = shalt.err (!%p160_p7)
}
  0x12   :  { %s239_s22 = smov 128   ;;  %s240_s23 = smov 8  }
  0x13   :  { %30 = dma.hbm_to_vmem [thread:$0]  %s312_s0, 256, %s25_s13, [#allocation3], %s239_s22, %s239_s22, %s240_s23  }
  0x14   :  { %s241_s26 = smov [#allocation5]   ;;  %s164_s30 = scalar_lea.hbm %s313_s1, 256 }
  0x15   :  { %s42_s27 = sshll.u32 %s241_s26, 4  ;;  %p165_p8 = scmp.ne.s32.totalorder %s313_s1, %s164_s30  ;;  %s43_s27 = int_to_ptr.vmem [resolvable:$true] %s42_s27 }
  0x16   :  { %p168_p9 = scmp.lt.u32.totalorder %s164_s30, %s313_s1 }
  0x18   :  { %p170_p10 = pnand %p168_p9, %p165_p8 }
  0x1a   :  { %173 = shalt.err (!%p170_p10)
}
  0x1b   :  { %s174_s8 = scalar_lea.vmem %s43_s27, 256  ;;  %p179_p12 = scmp.lt.s32.totalorder %s43_s27, %s43_s27 }
  0x1c   :  { %p175_p11 = scmp.ne.s32.totalorder %s43_s27, %s174_s8  ;;  %p180_p13 = scmp.lt.s32.totalorder %s174_s8, %s174_s8 }
  0x1e   :  { %p181_p0 = por %p180_p13, %p179_p12 }
  0x20   :  { %p182_p1 = pnand %p181_p0, %p175_p11 }
  0x22   :  { %185 = shalt.err (!%p182_p1)
}
  0x23   :  { %48 = dma.hbm_to_vmem [thread:$0]  %s313_s1, 256, %s43_s27, [#allocation6], %s239_s22, %s239_s22, %s240_s23  }
  0x24   :  { %230 = dma.done.wait [#allocation3], 256  }
  0x25   :  { %231 = vsyncadd [#allocation3], 4294967040 }
  0x26   :  { %232 = dma.done.wait [#allocation6], 256  }
  0x27   :  { %233 = vsyncadd [#allocation6], 4294967040  ;;  %v69_v0 = vld [vmem:[#allocation2] sm:$0xff]  ;;  %v70_v1 = vld [vmem:[#allocation2 + $0x8] sm:$0xff]  ;;  %s242_s1 = smov [#allocation7]   ;;  %s243_s11 = smov [#allocation8]  }
  0x28   :  { %v71_v2 = vmul.f32 0.5, %v69_v0  ;;  %v72_v3 = vmul.f32 0.5, %v70_v1  ;;  %v79_v5 = vld [vmem:[#allocation5] sm:$0xff]  ;;  %v80_v8 = vld [vmem:[#allocation5 + $0x8] sm:$0xff]  ;;  %s103_s10 = sshll.u32 %s242_s1, 4  ;;  %s113_s12 = sshll.u32 %s243_s11, 4  ;;  %s104_s10 = int_to_ptr.vmem [resolvable:$true] %s103_s10  ;;  %s114_s12 = int_to_ptr.vmem [resolvable:$true] %s113_s12 }
  0x29   :  { %v85_v11 = vmul.f32 %v79_v5, %v79_v5  ;;  %v86_v13 = vmul.f32 %v80_v8, %v80_v8  ;;  %s186_s13 = scalar_lea.vmem %s104_s10, 128  ;;  %p191_p3 = scmp.lt.s32.totalorder %s104_s10, %s104_s10 }
  0x2a   :  { %138 = vtanh.f32 %v71_v2  ;;  %p187_p2 = scmp.ne.s32.totalorder %s104_s10, %s186_s13  ;;  %p192_p4 = scmp.lt.s32.totalorder %s186_s13, %s186_s13 }
  0x2b   :  { %140 = vtanh.f32 %v72_v3 }
  0x2c   :  { %p193_p5 = por %p192_p4, %p191_p3 }
  0x2e   :  { %p194_p6 = pnand %p193_p5, %p187_p2 }
  0x34   :  { %v139_v4 = vpop.eup %138 }
  0x35   :  { %v141_v6 = vpop.eup %140  ;;  %v75_v7 = vmul.f32 0.5, %v139_v4 }
  0x36   :  { %v76_v9 = vmul.f32 0.5, %v141_v6 }
  0x37   :  { %v77_v10 = vadd.f32 0.5, %v75_v7 }
  0x38   :  { %v78_v12 = vadd.f32 0.5, %v76_v9 }
  0x39   :  { %v81_v14 = vmul.f32 %v79_v5, %v77_v10  ;;  %v83_v15 = vmul.f32 %v77_v10, %v77_v10 }
  0x3a   :  { %v82_v16 = vmul.f32 %v80_v8, %v78_v12  ;;  %v84_v17 = vmul.f32 %v78_v12, %v78_v12 }
  0x3b   :  { %v87_v18 = vadd.f32 %v85_v11, %v83_v15 }
  0x3c   :  { %v89_v19 = vadd.f32 %v82_v16, %v81_v14  ;;  %v88_v20 = vadd.f32 %v86_v13, %v84_v17 }
  0x3e   :  { %v90_v21 = vadd.f32 %v88_v20, %v87_v18  ;;  %93 = vst [vmem:[#allocation7] sm:$0xff] %v89_v19 }
  0x3f   :  { %197 = shalt.err (!%p194_p6)
}
  0x40   :  { %s198_s16 = scalar_lea.hbm %s314_s2, 128 }
  0x41   :  { %p199_p7 = scmp.ne.s32.totalorder %s314_s2, %s198_s16  ;;  %p202_p8 = scmp.lt.u32.totalorder %s198_s16, %s314_s2 }
  0x43   :  { %p204_p9 = pnand %p202_p8, %p199_p7 }
  0x45   :  { %207 = shalt.err (!%p204_p9)
}
  0x46   :  { %106 = dma.vmem_to_hbm [thread:$0]  %s104_s10, 128, %s314_s2, [#allocation4]   ;;  %96 = vst [vmem:[#allocation8] sm:$0xff] %v90_v21 }
  0x47   :  { %s208_s23 = scalar_lea.vmem %s114_s12, 128  ;;  %p213_p11 = scmp.lt.s32.totalorder %s114_s12, %s114_s12 }
  0x48   :  { %p209_p10 = scmp.ne.s32.totalorder %s114_s12, %s208_s23  ;;  %p214_p12 = scmp.lt.s32.totalorder %s208_s23, %s208_s23 }
  0x4a   :  { %p215_p13 = por %p214_p12, %p213_p11 }
  0x4c   :  { %p216_p0 = pnand %p215_p13, %p209_p10 }
  0x4e   :  { %219 = shalt.err (!%p216_p0)
}
  0x4f   :  { %s220_s26 = scalar_lea.hbm %s315_s3, 128 }
  0x50   :  { %p221_p1 = scmp.ne.s32.totalorder %s315_s3, %s220_s26  ;;  %p224_p2 = scmp.lt.u32.totalorder %s220_s26, %s315_s3 }
  0x52   :  { %p226_p3 = pnand %p224_p2, %p221_p1 }
  0x54   :  { %229 = shalt.err (!%p226_p3)
}
  0x55   :  { %116 = dma.vmem_to_hbm [thread:$0]  %s114_s12, 128, %s315_s3, [#allocation9]  }
  0x56   :  { %234 = dma.done.wait [#allocation4], 128  }
  0x57   :  { %235 = vsyncadd [#allocation4], 4294967168 }
  0x58   :  { %236 = dma.done.wait [#allocation9], 128  }
  0x59   :  { %237 = vsyncadd [#allocation9], 4294967168 }
  0x5a   :  { %123 = vsyncpa [#allocation3], 1 }
  0x5b   :  { %124 = vsyncpa [#allocation6], 1 }
  0x5c   :  { %125 = vsyncpa [#allocation4], 1 }
  0x5d   :  { %126 = vsyncpa [#allocation9], 1 }

</bundles_post_ra>
